<compile_context>
chip_gen: v5e
topology: v5e:2x2
jax: 0.10.0
libtpu: 0.0.40
codegen_flags: <defaults>
</compile_context>

<pallas_src>
import jax
import jax.numpy as jnp
from jax.experimental import pallas as pl
from jax.experimental.pallas import tpu as pltpu


def attn_kernel(x_ref, enc_ref, w1t_ref, b1_ref, w2at_ref, w2bt_ref, b2_ref,
                out_ref):
    # Per-block tiles:
    #   x_ref    : (BB, L)       enc_ref  : (BB, T, H)
    #   w1t_ref  : (L, H)        b1_ref   : (1, H)
    #   w2at_ref : (H, H)        w2bt_ref : (H, H)      b2_ref : (1, H)
    #   out_ref  : (BB, H)
    x = x_ref[...]                      # (BB, L)
    enc = enc_ref[...]                  # (BB, T, H)
    T = enc.shape[1]

    # proj = self.attn(input)  -> (BB, H)   (w1 already transposed in wrapper)
    proj = jnp.dot(x, w1t_ref[...],
                   preferred_element_type=jnp.float32) + b1_ref[...]

    # attn_scores_b = enc_b @ proj_b        -> (BB, T)
    # Batched matvec as broadcast-multiply + lane reduce over H (no enc.T,
    # no MXU latency chain for T=8, H=32).
    scores = jnp.sum(proj[:, None, :] * enc, axis=-1)           # (BB, T)

    # softmax over T (PyTorch dim=1 of the (B,T,1) score tensor), exact recip.
    m = jnp.max(scores, axis=-1, keepdims=True)
    e = jnp.exp(scores - m)
    inv_den = pl.reciprocal(jnp.sum(e, axis=-1, keepdims=True))
    attn = e * inv_den                                          # (BB, T)

    # context_b = attn_b @ enc_b            -> (BB, H)
    # Unrolled over the (static, small) T dim: T broadcast-multiply-adds on
    # the VPU instead of a cross-sublane reduce on the XLU.
    context = attn[:, 0:1] * enc[:, 0, :]
    for t in range(1, T):
        context = context + attn[:, t:t + 1] * enc[:, t, :]     # (BB, H)

    # output = tanh(attn_combine(cat(proj, context)))
    # cat([proj, context]) @ w2.T == proj @ w2a.T + context @ w2b.T
    # (w2a.T / w2b.T pre-split + pre-transposed in the wrapper, avoids a lane
    #  concat of two 32-lane operands.)
    out = jnp.tanh(
        jnp.dot(proj, w2at_ref[...], preferred_element_type=jnp.float32)
        + jnp.dot(context, w2bt_ref[...], preferred_element_type=jnp.float32)
        + b2_ref[...]
    )
    out_ref[...] = out.astype(out_ref.dtype)


def attn_forward(x, enc, w1, b1, w2, b2, *, max_block=1024):
    """x: (B,1,L), enc: (B,T,H), returns (B,H)."""
    B, _, L = x.shape
    _, T, H = enc.shape

    # ---- one-time layout plumbing in the wrapper (free vs. per-step XLU work)
    x2 = x.reshape(B, L)                 # (B, L)
    w1_t = w1.T                          # (L, H)
    w2a_t = w2[:, :H].T                  # (H, H)
    w2b_t = w2[:, H:].T                  # (H, H)

    # ---- batch tiling
    # Small / moderate B: one grid step, block == full batch dim (legal even
    # when B is not a multiple of 8) -> no padding, no extra grid steps.
    # Large B: 1024-row blocks (multiple of 8); the ragged tail block is
    # handled by Pallas boundary padding / masked output writes, so `enc` is
    # never copied or padded in HBM.  With >1 block the "parallel" grid axis
    # lets v7x shard across its two TensorCores only when each core already
    # has >=1024 rows of work.
    if B <= max_block:
        bb = B
        nblk = 1
    else:
        bb = max_block
        nblk = pl.cdiv(B, bb)

    out = pl.pallas_call(
        attn_kernel,
        out_shape=jax.ShapeDtypeStruct((B, H), jnp.float32),
        grid_spec=pltpu.PrefetchScalarGridSpec(
            num_scalar_prefetch=0,
            grid=(nblk,),
            in_specs=[
                pl.BlockSpec((bb, L), lambda i: (i, 0)),        # x (flattened)
                pl.BlockSpec((bb, T, H), lambda i: (i, 0, 0)),  # encoder_outputs
                pl.BlockSpec((L, H), lambda i: (0, 0)),         # w1^T (resident)
                pl.BlockSpec((1, H), lambda i: (0, 0)),         # b1
                pl.BlockSpec((H, H), lambda i: (0, 0)),         # w2[:, :H]^T
                pl.BlockSpec((H, H), lambda i: (0, 0)),         # w2[:, H:]^T
                pl.BlockSpec((1, H), lambda i: (0, 0)),         # b2
            ],
            out_specs=pl.BlockSpec((bb, H), lambda i: (i, 0)),
        ),
        compiler_params=pltpu.CompilerParams(
            dimension_semantics=("parallel",)),
    )(x2, enc, w1_t, b1, w2a_t, w2b_t, b2)
    return out


if __name__ == "__main__":
    B, T = 2, 8
    input_size, hidden_size = 32, 32

    key = jax.random.PRNGKey(0)
    ks = jax.random.split(key, 6)

    x = jax.random.normal(ks[0], (B, 1, input_size), jnp.float32)
    enc = jax.random.normal(ks[1], (B, T, hidden_size), jnp.float32)

    # Deterministic parameter init mimicking nn.Linear: U(-1/sqrt(in), 1/sqrt(in))
    k1 = 1.0 / (input_size ** 0.5)
    w1 = jax.random.uniform(ks[2], (hidden_size, input_size), jnp.float32, -k1, k1)
    b1 = jax.random.uniform(ks[3], (1, hidden_size), jnp.float32, -k1, k1)
    k2 = 1.0 / ((2 * hidden_size) ** 0.5)
    w2 = jax.random.uniform(ks[4], (hidden_size, 2 * hidden_size), jnp.float32, -k2, k2)
    b2 = jax.random.uniform(ks[5], (1, hidden_size), jnp.float32, -k2, k2)

    out = attn_forward(x, enc, w1, b1, w2, b2)
    jax.block_until_ready(out)

    # Pure-JAX reference matching the PyTorch forward exactly.
    proj = jnp.einsum("bil,hl->bih", x, w1) + b1                     # (B,1,H)
    scores = jnp.einsum("bth,bih->bti", enc, proj)                   # (B,T,1)
    attn = jax.nn.softmax(scores, axis=1)                            # softmax over T
    attn_t = jnp.swapaxes(attn, 1, 2)                                # (B,1,T)
    context = jnp.einsum("bit,bth->bih", attn_t, enc)[:, 0]          # (B,H)
    cat = jnp.concatenate([proj[:, 0], context], axis=1)             # (B,2H)
    ref = jnp.tanh(cat @ w2.T + b2)                                  # (B,H)

    # Exact reciprocal in the softmax -> only reduction-order / ~1 ulp
    # transcendental differences remain vs. the reference.
    err = float(jnp.max(jnp.abs(out - ref)))
    assert jnp.allclose(out, ref, atol=1e-4), err
    # TODO(synk): score_only / context_only branches of Attn.forward are not
    # exposed; only the default (full) path is implemented.
    print("KERNEL_OK")
</pallas_src>

<mosaic_0001>
module attributes {stable_mosaic.version = 11 : i64} {
  func.func @attn_kernel(%arg0: i32, %arg1: memref<2x32xf32, #tpu.memory_space<vmem>>, %arg2: memref<2x8x32xf32, #tpu.memory_space<vmem>>, %arg3: memref<32x32xf32, #tpu.memory_space<vmem>>, %arg4: memref<1x32xf32, #tpu.memory_space<vmem>>, %arg5: memref<32x32xf32, #tpu.memory_space<vmem>>, %arg6: memref<32x32xf32, #tpu.memory_space<vmem>>, %arg7: memref<1x32xf32, #tpu.memory_space<vmem>>, %arg8: memref<2x32xf32, #tpu.memory_space<vmem>>) attributes {dimension_semantics = [#tpu.dimension_semantics<parallel>], iteration_bounds = array<i64: 1>, scalar_prefetch = 0 : i64, scratch_operands = 0 : i64, tpu.core_type = #tpu.core_type<tc>, window_params = [{transform_indices = @transform_0, window_bounds = array<i64: 2, 32>}, {transform_indices = @transform_1, window_bounds = array<i64: 2, 8, 32>}, {pipeline_mode = #tpu.pipeline_mode<synchronous>, transform_indices = @transform_2, window_bounds = array<i64: 32, 32>}, {pipeline_mode = #tpu.pipeline_mode<synchronous>, transform_indices = @transform_3, window_bounds = array<i64: 1, 32>}, {pipeline_mode = #tpu.pipeline_mode<synchronous>, transform_indices = @transform_4, window_bounds = array<i64: 32, 32>}, {pipeline_mode = #tpu.pipeline_mode<synchronous>, transform_indices = @transform_5, window_bounds = array<i64: 32, 32>}, {pipeline_mode = #tpu.pipeline_mode<synchronous>, transform_indices = @transform_6, window_bounds = array<i64: 1, 32>}, {transform_indices = @transform_7, window_bounds = array<i64: 2, 32>}]} {
    %c0 = arith.constant 0 : index
    %c0_0 = arith.constant 0 : index
    %0 = vector.load %arg1[%c0, %c0_0] : memref<2x32xf32, #tpu.memory_space<vmem>>, vector<2x32xf32>
    %c0_1 = arith.constant 0 : index
    %c0_2 = arith.constant 0 : index
    %c0_3 = arith.constant 0 : index
    %1 = vector.load %arg2[%c0_1, %c0_2, %c0_3] : memref<2x8x32xf32, #tpu.memory_space<vmem>>, vector<2x8x32xf32>
    %c0_4 = arith.constant 0 : index
    %c0_5 = arith.constant 0 : index
    %2 = vector.load %arg3[%c0_4, %c0_5] : memref<32x32xf32, #tpu.memory_space<vmem>>, vector<32x32xf32>
    %cst = arith.constant dense<0.000000e+00> : vector<2x32xf32>
    %3 = tpu.matmul %0, %2, %cst {dimension_numbers = #tpu.dot_dimension_numbers<[1], [0], [0], [1], [0, 0, 1, 1], [], []>} : vector<2x32xf32>, vector<32x32xf32>, vector<2x32xf32> -> vector<2x32xf32>
    %c0_6 = arith.constant 0 : index
    %c0_7 = arith.constant 0 : index
    %4 = vector.load %arg4[%c0_6, %c0_7] : memref<1x32xf32, #tpu.memory_space<vmem>>, vector<1x32xf32>
    %5 = vector.broadcast %4 : vector<1x32xf32> to vector<2x32xf32>
    %6 = arith.addf %3, %5 : vector<2x32xf32>
    %7 = vector.shape_cast %6 : vector<2x32xf32> to vector<2x1x32xf32>
    %8 = vector.broadcast %7 : vector<2x1x32xf32> to vector<2x8x32xf32>
    %9 = arith.mulf %8, %1 : vector<2x8x32xf32>
    %cst_8 = arith.constant dense<0.000000e+00> : vector<2x8xf32>
    %10 = vector.multi_reduction <add>, %9, %cst_8 [2] : vector<2x8x32xf32> to vector<2x8xf32>
    %cst_9 = arith.constant dense<0xFF800000> : vector<2xf32>
    %11 = vector.multi_reduction <maximumf>, %10, %cst_9 [1] : vector<2x8xf32> to vector<2xf32>
    %12 = vector.shape_cast %11 : vector<2xf32> to vector<2x1xf32>
    %13 = vector.broadcast %12 : vector<2x1xf32> to vector<2x8xf32>
    %14 = arith.subf %10, %13 : vector<2x8xf32>
    %15 = math.exp %14 : vector<2x8xf32>
    %cst_10 = arith.constant dense<0.000000e+00> : vector<2xf32>
    %16 = vector.multi_reduction <add>, %15, %cst_10 [1] : vector<2x8xf32> to vector<2xf32>
    %17 = vector.shape_cast %16 : vector<2xf32> to vector<2x1xf32>
    %18 = tpu.reciprocal %17 : vector<2x1xf32> -> vector<2x1xf32>
    %19 = vector.broadcast %18 : vector<2x1xf32> to vector<2x8xf32>
    %20 = arith.mulf %15, %19 : vector<2x8xf32>
    %21 = vector.extract_strided_slice %20 {offsets = [0, 0], sizes = [2, 1], strides = [1, 1]} : vector<2x8xf32> to vector<2x1xf32>
    %22 = vector.extract_strided_slice %1 {offsets = [0, 0, 0], sizes = [2, 1, 32], strides = [1, 1, 1]} : vector<2x8x32xf32> to vector<2x1x32xf32>
    %23 = vector.shape_cast %22 : vector<2x1x32xf32> to vector<2x32xf32>
    %24 = vector.broadcast %21 : vector<2x1xf32> to vector<2x32xf32>
    %25 = arith.mulf %24, %23 : vector<2x32xf32>
    %26 = vector.extract_strided_slice %20 {offsets = [0, 1], sizes = [2, 1], strides = [1, 1]} : vector<2x8xf32> to vector<2x1xf32>
    %27 = vector.extract_strided_slice %1 {offsets = [0, 1, 0], sizes = [2, 1, 32], strides = [1, 1, 1]} : vector<2x8x32xf32> to vector<2x1x32xf32>
    %28 = vector.shape_cast %27 : vector<2x1x32xf32> to vector<2x32xf32>
    %29 = vector.broadcast %26 : vector<2x1xf32> to vector<2x32xf32>
    %30 = arith.mulf %29, %28 : vector<2x32xf32>
    %31 = arith.addf %25, %30 : vector<2x32xf32>
    %32 = vector.extract_strided_slice %20 {offsets = [0, 2], sizes = [2, 1], strides = [1, 1]} : vector<2x8xf32> to vector<2x1xf32>
    %33 = vector.extract_strided_slice %1 {offsets = [0, 2, 0], sizes = [2, 1, 32], strides = [1, 1, 1]} : vector<2x8x32xf32> to vector<2x1x32xf32>
    %34 = vector.shape_cast %33 : vector<2x1x32xf32> to vector<2x32xf32>
    %35 = vector.broadcast %32 : vector<2x1xf32> to vector<2x32xf32>
    %36 = arith.mulf %35, %34 : vector<2x32xf32>
    %37 = arith.addf %31, %36 : vector<2x32xf32>
    %38 = vector.extract_strided_slice %20 {offsets = [0, 3], sizes = [2, 1], strides = [1, 1]} : vector<2x8xf32> to vector<2x1xf32>
    %39 = vector.extract_strided_slice %1 {offsets = [0, 3, 0], sizes = [2, 1, 32], strides = [1, 1, 1]} : vector<2x8x32xf32> to vector<2x1x32xf32>
    %40 = vector.shape_cast %39 : vector<2x1x32xf32> to vector<2x32xf32>
    %41 = vector.broadcast %38 : vector<2x1xf32> to vector<2x32xf32>
    %42 = arith.mulf %41, %40 : vector<2x32xf32>
    %43 = arith.addf %37, %42 : vector<2x32xf32>
    %44 = vector.extract_strided_slice %20 {offsets = [0, 4], sizes = [2, 1], strides = [1, 1]} : vector<2x8xf32> to vector<2x1xf32>
    %45 = vector.extract_strided_slice %1 {offsets = [0, 4, 0], sizes = [2, 1, 32], strides = [1, 1, 1]} : vector<2x8x32xf32> to vector<2x1x32xf32>
    %46 = vector.shape_cast %45 : vector<2x1x32xf32> to vector<2x32xf32>
    %47 = vector.broadcast %44 : vector<2x1xf32> to vector<2x32xf32>
    %48 = arith.mulf %47, %46 : vector<2x32xf32>
    %49 = arith.addf %43, %48 : vector<2x32xf32>
    %50 = vector.extract_strided_slice %20 {offsets = [0, 5], sizes = [2, 1], strides = [1, 1]} : vector<2x8xf32> to vector<2x1xf32>
    %51 = vector.extract_strided_slice %1 {offsets = [0, 5, 0], sizes = [2, 1, 32], strides = [1, 1, 1]} : vector<2x8x32xf32> to vector<2x1x32xf32>
    %52 = vector.shape_cast %51 : vector<2x1x32xf32> to vector<2x32xf32>
    %53 = vector.broadcast %50 : vector<2x1xf32> to vector<2x32xf32>
    %54 = arith.mulf %53, %52 : vector<2x32xf32>
    %55 = arith.addf %49, %54 : vector<2x32xf32>
    %56 = vector.extract_strided_slice %20 {offsets = [0, 6], sizes = [2, 1], strides = [1, 1]} : vector<2x8xf32> to vector<2x1xf32>
    %57 = vector.extract_strided_slice %1 {offsets = [0, 6, 0], sizes = [2, 1, 32], strides = [1, 1, 1]} : vector<2x8x32xf32> to vector<2x1x32xf32>
    %58 = vector.shape_cast %57 : vector<2x1x32xf32> to vector<2x32xf32>
    %59 = vector.broadcast %56 : vector<2x1xf32> to vector<2x32xf32>
    %60 = arith.mulf %59, %58 : vector<2x32xf32>
    %61 = arith.addf %55, %60 : vector<2x32xf32>
    %62 = vector.extract_strided_slice %20 {offsets = [0, 7], sizes = [2, 1], strides = [1, 1]} : vector<2x8xf32> to vector<2x1xf32>
    %63 = vector.extract_strided_slice %1 {offsets = [0, 7, 0], sizes = [2, 1, 32], strides = [1, 1, 1]} : vector<2x8x32xf32> to vector<2x1x32xf32>
    %64 = vector.shape_cast %63 : vector<2x1x32xf32> to vector<2x32xf32>
    %65 = vector.broadcast %62 : vector<2x1xf32> to vector<2x32xf32>
    %66 = arith.mulf %65, %64 : vector<2x32xf32>
    %67 = arith.addf %61, %66 : vector<2x32xf32>
    %c0_11 = arith.constant 0 : index
    %c0_12 = arith.constant 0 : index
    %68 = vector.load %arg5[%c0_11, %c0_12] : memref<32x32xf32, #tpu.memory_space<vmem>>, vector<32x32xf32>
    %cst_13 = arith.constant dense<0.000000e+00> : vector<2x32xf32>
    %69 = tpu.matmul %6, %68, %cst_13 {dimension_numbers = #tpu.dot_dimension_numbers<[1], [0], [0], [1], [0, 0, 1, 1], [], []>} : vector<2x32xf32>, vector<32x32xf32>, vector<2x32xf32> -> vector<2x32xf32>
    %c0_14 = arith.constant 0 : index
    %c0_15 = arith.constant 0 : index
    %70 = vector.load %arg6[%c0_14, %c0_15] : memref<32x32xf32, #tpu.memory_space<vmem>>, vector<32x32xf32>
    %cst_16 = arith.constant dense<0.000000e+00> : vector<2x32xf32>
    %71 = tpu.matmul %67, %70, %cst_16 {dimension_numbers = #tpu.dot_dimension_numbers<[1], [0], [0], [1], [0, 0, 1, 1], [], []>} : vector<2x32xf32>, vector<32x32xf32>, vector<2x32xf32> -> vector<2x32xf32>
    %72 = arith.addf %69, %71 : vector<2x32xf32>
    %c0_17 = arith.constant 0 : index
    %c0_18 = arith.constant 0 : index
    %73 = vector.load %arg7[%c0_17, %c0_18] : memref<1x32xf32, #tpu.memory_space<vmem>>, vector<1x32xf32>
    %74 = vector.broadcast %73 : vector<1x32xf32> to vector<2x32xf32>
    %75 = arith.addf %72, %74 : vector<2x32xf32>
    %76 = math.tanh %75 : vector<2x32xf32>
    %c0_19 = arith.constant 0 : index
    %c0_20 = arith.constant 0 : index
    %77 = vector.load %arg8[%c0_19, %c0_20] : memref<2x32xf32, #tpu.memory_space<vmem>>, vector<2x32xf32>
    tpu.vector_store %arg8[%c0_19, %c0_20], %76 {strides = array<i32>} : memref<2x32xf32, #tpu.memory_space<vmem>>, vector<2x32xf32>,
    return
  }
  func.func @transform_0(%arg0: i32) -> (i32, i32) {
    %c0_i32 = arith.constant 0 : i32
    %c0_i32_0 = arith.constant 0 : i32
    return %arg0, %c0_i32 : i32, i32
  }
  func.func @transform_1(%arg0: i32) -> (i32, i32, i32) {
    %c0_i32 = arith.constant 0 : i32
    %c0_i32_0 = arith.constant 0 : i32
    %c0_i32_1 = arith.constant 0 : i32
    return %arg0, %c0_i32, %c0_i32_0 : i32, i32, i32
  }
  func.func @transform_2(%arg0: i32) -> (i32, i32) {
    %c0_i32 = arith.constant 0 : i32
    %c0_i32_0 = arith.constant 0 : i32
    %c0_i32_1 = arith.constant 0 : i32
    return %c0_i32, %c0_i32_0 : i32, i32
  }
  func.func @transform_3(%arg0: i32) -> (i32, i32) {
    %c0_i32 = arith.constant 0 : i32
    %c0_i32_0 = arith.constant 0 : i32
    %c0_i32_1 = arith.constant 0 : i32
    return %c0_i32, %c0_i32_0 : i32, i32
  }
  func.func @transform_4(%arg0: i32) -> (i32, i32) {
    %c0_i32 = arith.constant 0 : i32
    %c0_i32_0 = arith.constant 0 : i32
    %c0_i32_1 = arith.constant 0 : i32
    return %c0_i32, %c0_i32_0 : i32, i32
  }
  func.func @transform_5(%arg0: i32) -> (i32, i32) {
    %c0_i32 = arith.constant 0 : i32
    %c0_i32_0 = arith.constant 0 : i32
    %c0_i32_1 = arith.constant 0 : i32
    return %c0_i32, %c0_i32_0 : i32, i32
  }
  func.func @transform_6(%arg0: i32) -> (i32, i32) {
    %c0_i32 = arith.constant 0 : i32
    %c0_i32_0 = arith.constant 0 : i32
    %c0_i32_1 = arith.constant 0 : i32
    return %c0_i32, %c0_i32_0 : i32, i32
  }
  func.func @transform_7(%arg0: i32) -> (i32, i32) {
    %c0_i32 = arith.constant 0 : i32
    %c0_i32_0 = arith.constant 0 : i32
    return %arg0, %c0_i32 : i32, i32
  }
}

</mosaic_0001>

<bundles_post_ra>
// kernel: tpu_custom_call.1
= control target key start
LH: loop header
LB: loop body
LE: loop exit
PB: predicated region body
PF: predicated region fallthrough
CT: control target
= control target key end

     0   :  { %12 = vsyncpa [#allocation3], 0  ;;  %s1662_s0 = inlined_call_operand.hbm [shape: f32[2,32], index: 0, kind: input, shape index: {}]   ;;  %s1663_s1 = inlined_call_operand.hbm [shape: f32[2,8,32], index: 1, kind: input, shape index: {}]   ;;  %s1664_s2 = inlined_call_operand.hbm [shape: f32[32,32], index: 2, kind: input, shape index: {}]   ;;  %s1665_s3 = inlined_call_operand.vmem [shape: f32[1,32], index: 3, kind: input, shape index: {}]   ;;  %s1666_s4 = inlined_call_operand.hbm [shape: f32[32,32], index: 4, kind: input, shape index: {}]   ;;  %s1667_s5 = inlined_call_operand.hbm [shape: f32[32,32], index: 5, kind: input, shape index: {}]   ;;  %s1668_s6 = inlined_call_operand.vmem [shape: f32[1,32], index: 6, kind: input, shape index: {}]   ;;  %s1669_s7 = inlined_call_operand.hbm [shape: f32[2,32], index: 7, kind: output, shape index: {}]  }
   0x1   :  { %13 = vsyncpa [#allocation6], 0 }
   0x2   :  { %14 = vsyncpa [#allocation9], 0  ;;  %s31_s26 = sshll.u32 %s1663_s1, 4  ;;  %s32_s26 = int_to_ptr.hbm [resolvable:$true] %s31_s26 }
   0x3   :  { %15 = vsyncpa [#allocation4], 0  ;;  %s1177_s27 = smov [#allocation5]   ;;  %s59_s8 = sshll.u32 %s1666_s4, 4  ;;  %s60_s8 = int_to_ptr.hbm [resolvable:$true] %s59_s8 }
   0x4   :  { %s33_s28 = sshll.u32 %s1177_s27, 4  ;;  %s1178_s9 = smov 128   ;;  %s34_s28 = int_to_ptr.vmem [resolvable:$true] %s33_s28 }
   0x5   :  { %s1179_s10 = smov 8   ;;  %s1180_s11 = smov [#allocation8]  }
   0x6   :  { %39 = dma.hbm_to_vmem [thread:$0]  %s32_s26, 256, %s34_s28, [#allocation6], %s1178_s9, %s1178_s9, %s1179_s10  }
   0x7   :  { %s61_s12 = sshll.u32 %s1180_s11, 4  ;;  %s21_s15 = sshll.u32 %s1662_s0, 4  ;;  %s62_s12 = int_to_ptr.vmem [resolvable:$true] %s61_s12  ;;  %s22_s15 = int_to_ptr.hbm [resolvable:$true] %s21_s15 }
   0x8   :  { %67 = dma.hbm_to_vmem [thread:$0]  %s60_s8, 512, %s62_s12, [#allocation9], %s1178_s9, %s1178_s9, %s1179_s10  }
   0x9   :  { %s44_s17 = sshll.u32 %s1664_s2, 4  ;;  %s1181_s18 = smov [#allocation2]   ;;  %s45_s17 = int_to_ptr.hbm [resolvable:$true] %s44_s17 }
   0xa   :  { %s23_s19 = sshll.u32 %s1181_s18, 4  ;;  %s1182_s4 = smov [#allocation7]   ;;  %s24_s19 = int_to_ptr.vmem [resolvable:$true] %s23_s19 }
   0xb   :  { %26 = dma.hbm_to_vmem [thread:$0]  %s22_s15, 32, %s24_s19, [#allocation3]  }
   0xc   :  { %s46_s20 = sshll.u32 %s1182_s4, 4  ;;  %s72_s23 = sshll.u32 %s1667_s5, 4  ;;  %s47_s20 = int_to_ptr.vmem [resolvable:$true] %s46_s20  ;;  %s73_s23 = int_to_ptr.hbm [resolvable:$true] %s72_s23 }
   0xd   :  { %52 = dma.hbm_to_vmem [thread:$0]  %s45_s17, 512, %s47_s20, [#allocation6], %s1178_s9, %s1178_s9, %s1179_s10  }
   0xe   :  { %s1183_s0 = smov [#allocation10]  }
   0xf   :  { %s74_s24 = sshll.u32 %s1183_s0, 4  ;;  %s75_s24 = int_to_ptr.vmem [resolvable:$true] %s74_s24 }
  0x10   :  { %80 = dma.hbm_to_vmem [thread:$0]  %s73_s23, 512, %s75_s24, [#allocation9], %s1178_s9, %s1178_s9, %s1179_s10  }
  0x11   :  { %1169 = dma.done.wait [#allocation3], 32  }
  0x12   :  { %1170 = vsyncadd [#allocation3], 4294967264 }
  0x13   :  { %1171 = dma.done.wait [#allocation6], 768  }
  0x14   :  { %1172 = vsyncadd [#allocation6], 4294966528 }
  0x15   :  { %1173 = dma.done.wait [#allocation9], 1024  }
  0x16   :  { %1174 = vsyncadd [#allocation9], 4294966272  ;;  %v154_v0 = vlaneseq  ;;  %v109_v3 = vld [vmem:[#allocation7 + $0x18] sm:$0xff]  ;;  %v108_v4 = vld [vmem:[#allocation7 + $0x10] sm:$0xff]  ;;  %vm114_vm0 = vcmask 261120   ;;  %vm158_vm1 = vcmask 1041409  }
  0x17   :  { %130 = vmatpush.msra.mxu0 %v109_v3  ;;  %v1250_v5 = vld [vmem:[#allocation5] sm:$0xff]  ;;  %v107_v6 = vld [vmem:[#allocation7 + $0x8] sm:$0xff]  ;;  %v106_v8 = vld [vmem:[#allocation7] sm:$0xff]  ;;  %vm161_vm2 = vcmask 58368   ;;  %v1184_v63 = vmov 0   ;;  %vm857_vm7 = vcmask 130112  }
  0x18   :  { %v1242_v1 = vshrl.u32 %v154_v0, 7  ;;  %v1253_v7 = vperm.slane %v1250_v5, 0  ;;  %v103_v9 = vld [vmem:[#allocation2] sm:$0x3]  ;;  %v1261_v11 = vld [vmem:[#allocation5 + $0x8] sm:$0xff]  ;;  %v1273_v14 = vperm.slane %v1250_v5, 1 }
  0x19   :  { %131 = vmatpush.msra.mxu0 %v108_v4  ;;  %v241_v12 = vperm.slane %v1261_v11, 0  ;;  %v309_v15 = vperm.slane %v1261_v11, 1  ;;  %v817_v16 = vld [vmem:[#allocation8 + $0x18] sm:$0xff]  ;;  %v816_v17 = vld [vmem:[#allocation8 + $0x10] sm:$0xff]  ;;  %v815_v18 = vld [vmem:[#allocation8 + $0x8] sm:$0xff]  ;;  %v1287_v20 = vperm.slane %v1250_v5, 2 }
  0x1a   :  { %v1245_v2 = vadd.s32 8, %v1242_v1  ;;  %961 = vset.pattern.permute.xlu2 %v1242_v1  ;;  %v1258_v10 = vadd.s32 16, %v1242_v1  ;;  %v1267_v13 = vadd.s32 24, %v1242_v1  ;;  %911 = vmatpush.msra.mxu2 %v817_v16  ;;  %v814_v19 = vld [vmem:[#allocation8] sm:$0xff]  ;;  %v1293_v21 = vperm.slane %v1261_v11, 2  ;;  %s1185_s26 = smov [#allocation11]  }
  0x1b   :  { %132 = vmatpush.msra.mxu0 %v107_v6  ;;  %v1015_v22 = vld [vmem:[%s1665_s3] ss:$0 sm:$0xff]  ;;  %v436_v32 = vperm.slane %v1250_v5, 3  ;;  %v461_v33 = vperm.slane %v1261_v11, 3  ;;  %v1322_v34 = vperm.slane %v1250_v5, 4  ;;  %v1328_v35 = vperm.slane %v1261_v11, 4 }
  0x1c   :  { %958 = vset.pattern.permute.xlu1 %v1245_v2  ;;  %962 = vset.pattern.permute.xlu0 %v1245_v2  ;;  %v1337_v37 = vand.u32 127, %v154_v0  ;;  %v613_v40 = vperm.slane %v1261_v11, 5  ;;  %v1351_v44 = vperm.slane %v1250_v5, 5  ;;  %v1372_v51 = vperm.slane %v1261_v11, 6  ;;  %s932_s27 = sshll.u32 %s1185_s26, 4  ;;  %s934_s30 = sshll.u32 %s1669_s7, 4  ;;  %s933_s27 = int_to_ptr.vmem [resolvable:$true] %s932_s27  ;;  %s935_s30 = int_to_ptr.hbm [resolvable:$true] %s934_s30 }
  0x1d   :  { %133 = vmatpush.msra.mxu0 %v106_v8  ;;  %912 = vmatpush.msra.mxu2 %v816_v17  ;;  %v1391_v56 = vperm.slane %v1250_v5, 6  ;;  %vm861_vm8 = vcmask 195712   ;;  %vm865_vm9 = vcmask 261312   ;;  %vm925_vm10 = vcmask 254976  }
  0x1e   :  { %946 = vmatmul.msk.f32.vlgmr.msra.gmra.mxu0 %vm114_vm0, %v103_v9  ;;  %1672 = vst [vmem:[#allocation16_spill] sm:$0xff] %v1337_v37 }
  0x1f   :  { %913 = vmatpush.msra.mxu2 %v815_v18 }
  0x21   :  { %914 = vmatpush.msra.mxu2 %v814_v19 }
  0x22   :  { %246 = vperm.xlu2 %961, %v241_v12  }
  0x24   :  { %227 = vperm.xlu1 %958, %v1253_v7  }
  0x2a   :  { %966 = vset.pattern.permute.xlu2 %v1258_v10 }
  0x2c   :  { %959 = vset.pattern.permute.xlu1 %v1258_v10 }
  0x32   :  { %301 = vperm.xlu2 %966, %v1273_v14  }
  0x34   :  { %233 = vperm.xlu1 %959, %v1253_v7  }
  0x3a   :  { %968 = vset.pattern.permute.xlu2 %v1242_v1 }
  0x3c   :  { %960 = vset.pattern.permute.xlu1 %v1267_v13 }
  0x42   :  { %314 = vperm.xlu2 %968, %v309_v15  }
  0x44   :  { %239 = vperm.xlu1 %960, %v1253_v7  }
  0x4a   :  { %970 = vset.pattern.permute.xlu2 %v1267_v13 }
  0x4c   :  { %963 = vset.pattern.permute.xlu1 %v1258_v10 }
  0x52   :  { %332 = vperm.xlu2 %970, %v309_v15  }
  0x54   :  { %258 = vperm.xlu1 %963, %v241_v12  }
  0x5a   :  { %972 = vset.pattern.permute.xlu2 %v1245_v2 }
  0x5c   :  { %964 = vset.pattern.permute.xlu1 %v1267_v13 }
  0x62   :  { %371 = vperm.xlu2 %972, %v1287_v20  }
  0x64   :  { %264 = vperm.xlu1 %964, %v241_v12  }
  0x6a   :  { %974 = vset.pattern.permute.xlu2 %v1242_v1 }
  0x6c   :  { %965 = vset.pattern.permute.xlu1 %v1245_v2 }
  0x72   :  { %390 = vperm.xlu2 %974, %v1293_v21  }
  0x74   :  { %295 = vperm.xlu1 %965, %v1273_v14  }
  0x7a   :  { %976 = vset.pattern.permute.xlu2 %v1258_v10 }
  0x7c   :  { %967 = vset.pattern.permute.xlu1 %v1267_v13  ;;  %v1393_v57 = vpop.permute.xlu2 %246 }
  0x82   :  { %402 = vperm.xlu2 %976, %v1293_v21  }
  0x84   :  { %307 = vperm.xlu1 %967, %v1273_v14  }
  0x8a   :  { %978 = vset.pattern.permute.xlu2 %v1245_v2 }
  0x8c   :  { %969 = vset.pattern.permute.xlu1 %v1258_v10  ;;  %v1398_v59 = vpop.permute.xlu2 %301 }
  0x92   :  { %447 = vperm.xlu2 %978, %v436_v32  }
  0x94   :  { %326 = vperm.xlu1 %969, %v309_v15  }
  0x96   :  { %v1347_v42 = vpop.permute.xlu1 %227 }
  0x9a   :  { %980 = vset.pattern.permute.xlu2 %v1267_v13 }
  0x9b   :  { %v135_v23 = vpop.f32.mrf.mxu0 }
  0x9c   :  { %971 = vset.pattern.permute.xlu1 %v1242_v1  ;;  %v136_v24 = vadd.f32 %v1015_v22, %v135_v23  ;;  %v1404_v61 = vpop.permute.xlu2 %314 }
  0x9e   :  { %948 = vmatmul.msk.f32.vlgmr.msra.gmra.mxu2 %vm114_vm0, %v136_v24  ;;  %v140_v25 = vperm.slane %v136_v24, 0  ;;  %v139_v26 = vrot.slane %v136_v24, 1 }
  0xa0   :  { %v144_v27 = vmul.f32 %v140_v25, %v1250_v5  ;;  %v141_v29 = vperm.slane %v139_v26, 0  ;;  %v740_v26 = vperm.slane %v1250_v5, 7 }
  0xa2   :  { %v146_v28 = vsel %vm114_vm0, %v144_v27, 0.0  ;;  %v145_v30 = vmul.f32 %v141_v29, %v1261_v11  ;;  %459 = vperm.xlu2 %980, %v436_v32  }
  0xa3   :  { %147 = vadd.xlane.f32.xlu0 %v146_v28 }
  0xa4   :  { %365 = vperm.xlu1 %971, %v1287_v20   ;;  %v149_v31 = vsel %vm114_vm0, %v145_v30, 0.0 }
  0xa6   :  { %v1356_v46 = vpop.permute.xlu1 %233 }
  0xaa   :  { %982 = vset.pattern.permute.xlu2 %v1258_v10 }
  0xab   :  { %150 = vadd.xlane.f32.xlu0 %v149_v31 }
  0xac   :  { %973 = vset.pattern.permute.xlu1 %v1267_v13  ;;  %v1410_v0 = vpop.permute.xlu2 %332 }
  0xb2   :  { %478 = vperm.xlu2 %982, %v461_v33  }
  0xb4   :  { %383 = vperm.xlu1 %973, %v1287_v20  }
  0xb6   :  { %v1359_v47 = vpop.permute.xlu1 %239 }
  0xba   :  { %984 = vset.pattern.permute.xlu2 %v1242_v1 }
  0xbc   :  { %975 = vset.pattern.permute.xlu1 %v1245_v2  ;;  %v1415_v4 = vpop.permute.xlu2 %371 }
  0xbf   :  { %252 = vperm.xlu0 %962, %v241_v12  }
  0xc2   :  { %517 = vperm.xlu2 %984, %v1322_v34  }
  0xc4   :  { %396 = vperm.xlu1 %975, %v1293_v21  }
  0xc6   :  { %v1362_v48 = vpop.permute.xlu1 %258 }
  0xc7   :  { %320 = vperm.xlu0 %962, %v309_v15  }
  0xca   :  { %986 = vset.pattern.permute.xlu2 %v1245_v2 }
  0xcc   :  { %977 = vset.pattern.permute.xlu1 %v1242_v1 }
  0xcf   :  { %523 = vperm.xlu0 %962, %v1322_v34  }
  0xd2   :  { %548 = vperm.xlu2 %986, %v1328_v35  }
  0xd4   :  { %441 = vperm.xlu1 %977, %v436_v32  }
  0xd6   :  { %v1365_v49 = vpop.permute.xlu1 %264 }
  0xd7   :  { %624 = vperm.xlu0 %962, %v613_v40  }
  0xda   :  { %988 = vset.pattern.permute.xlu2 %v1258_v10 }
  0xdc   :  { %979 = vset.pattern.permute.xlu1 %v1258_v10 }
  0xdf   :  { %993 = vset.pattern.permute.xlu0 %v1258_v10 }
  0xe2   :  { %554 = vperm.xlu2 %988, %v1328_v35  }
  0xe4   :  { %453 = vperm.xlu1 %979, %v436_v32   ;;  %v765_v32 = vperm.slane %v1261_v11, 7 }
  0xe6   :  { %v1369_v50 = vpop.permute.xlu1 %295 }
  0xe7   :  { %377 = vperm.xlu0 %993, %v1287_v20  }
  0xea   :  { %991 = vset.pattern.permute.xlu2 %v1242_v1 }
  0xec   :  { %981 = vset.pattern.permute.xlu1 %v1245_v2 }
  0xef   :  { %706 = vperm.xlu0 %993, %v1372_v51  }
  0xf2   :  { %593 = vperm.xlu2 %991, %v1351_v44  }
  0xf4   :  { %472 = vperm.xlu1 %981, %v461_v33  }
  0xf6   :  { %v1376_v52 = vpop.permute.xlu1 %307 }
  0xf7   :  { %1001 = vset.pattern.permute.xlu0 %v1242_v1 }
  0xfa   :  { %618 = vperm.xlu2 %991, %v613_v40  }
  0xfc   :  { %983 = vset.pattern.permute.xlu1 %v1267_v13 }
  0xff   :  { %221 = vperm.xlu0 %1001, %v1253_v7   ;;  %v1419_v7 = vpop.permute.xlu2 %390 }
 0x102   :  { %995 = vset.pattern.permute.xlu2 %v1258_v10 }
 0x104   :  { %484 = vperm.xlu1 %983, %v461_v33  }
 0x106   :  { %v1380_v53 = vpop.permute.xlu1 %326 }
 0x107   :  { %289 = vperm.xlu0 %1001, %v1273_v14   ;;  %v1421_v14 = vpop.permute.xlu2 %402 }
 0x10a   :  { %630 = vperm.xlu2 %995, %v613_v40  }
 0x10c   :  { %985 = vset.pattern.permute.xlu1 %v1242_v1 }
 0x10f   :  { %466 = vperm.xlu0 %1001, %v461_v33   ;;  %v1425_v19 = vpop.permute.xlu2 %447 }
 0x112   :  { %997 = vset.pattern.permute.xlu2 %v1267_v13 }
 0x116   :  { %v1333_v36 = vpop.xlane.xlu0 %147  ;;  %v1384_v54 = vpop.permute.xlu1 %365 }
 0x117   :  { %v156_v41 = vperm.slane %v1333_v36, %v1337_v37  ;;  %669 = vperm.xlu0 %1001, %v1391_v56   ;;  %v1433_v23 = vpop.permute.xlu2 %459 }
 0x11a   :  { %636 = vperm.xlu2 %997, %v613_v40  }
 0x11e   :  { %v1339_v38 = vpop.xlane.xlu0 %150 }
 0x11f   :  { %v157_v39 = vperm.slane %v1339_v38, %v1337_v37  ;;  %v1437_v24 = vpop.permute.xlu2 %478  ;;  %770 = vperm.xlu0 %1001, %v765_v32  }
 0x121   :  { %v159_v43 = vsel %vm158_vm1, %v157_v39, %v156_v41 }
 0x122   :  { %v162_v45 = vsel %vm161_vm2, %v159_v43, -inf  ;;  %999 = vset.pattern.permute.xlu2 %v1242_v1 }
 0x126   :  { %v1388_v55 = vpop.permute.xlu1 %383 }
 0x127   :  { %v1440_v25 = vpop.permute.xlu2 %517  ;;  %1007 = vset.pattern.permute.xlu0 %v1267_v13 }
 0x12a   :  { %694 = vperm.xlu2 %999, %v1372_v51  }
 0x12e   :  { %163 = vmax.xlane.f32.xlu1 %v162_v45 }
 0x12f   :  { %v1444_v27 = vpop.permute.xlu2 %548  ;;  %408 = vperm.xlu0 %1007, %v1293_v21  }
 0x132   :  { %1000 = vset.pattern.permute.xlu2 %v1258_v10 }
 0x136   :  { %v1396_v58 = vpop.permute.xlu1 %396 }
 0x137   :  { %535 = vperm.xlu0 %1007, %v1322_v34  }
 0x13a   :  { %681 = vperm.xlu2 %1000, %v1391_v56  }
 0x13c   :  { %v1448_v28 = vpop.permute.xlu2 %554 }
 0x13d   :  { %1674 = vst [vmem:[#allocation18_spill] sm:$0xff] %v1448_v28 }
 0x13f   :  { %788 = vperm.xlu0 %1007, %v765_v32  }
 0x142   :  { %1003 = vset.pattern.permute.xlu2 %v1267_v13 }
 0x146   :  { %v1402_v60 = vpop.permute.xlu1 %441 }
 0x147   :  { %542 = vperm.xlu1 %985, %v1328_v35   ;;  %1014 = vset.pattern.permute.xlu0 %v1184_v63 }
 0x14a   :  { %712 = vperm.xlu2 %1003, %v1372_v51  }
 0x14c   :  { %v1451_v29 = vpop.permute.xlu2 %593 }
 0x14f   :  { %987 = vset.pattern.permute.xlu1 %v1258_v10 }
 0x152   :  { %1005 = vset.pattern.permute.xlu2 %v1184_v63 }
 0x154   :  { %v1455_v30 = vpop.permute.xlu2 %618 }
 0x155   :  { %1675 = vst [vmem:[#allocation19_spill] sm:$0xff] %v1455_v30 }
 0x156   :  { %v1407_v62 = vpop.permute.xlu1 %453 }
 0x157   :  { %529 = vperm.xlu1 %987, %v1322_v34  }
 0x15f   :  { %989 = vset.pattern.permute.xlu1 %v1184_v63 }
 0x164   :  { %v1458_v5 = vpop.permute.xlu2 %630 }
 0x165   :  { %1676 = vst [vmem:[#allocation20_spill] sm:$0xff] %v1458_v5 }
 0x166   :  { %v1413_v3 = vpop.permute.xlu1 %472 }
 0x174   :  { %v1461_v31 = vpop.permute.xlu2 %636 }
 0x175   :  { %1677 = vst [vmem:[#allocation21_spill] sm:$0xff] %v1461_v31 }
 0x176   :  { %v1417_v6 = vpop.permute.xlu1 %484 }
 0x177   :  { %1673 = vst [vmem:[#allocation17_spill] sm:$0xff] %v1417_v6 }
 0x184   :  { %v1466_v33 = vpop.permute.xlu2 %694 }
 0x185   :  { %1678 = vst [vmem:[#allocation22_spill] sm:$0xff] %v1466_v33 }
 0x1a1   :  { %v164_v8 = vpop.xlane.xlu1 %163 }
 0x1a2   :  { %v166_v9 = vperm.slane %v164_v8, 0  ;;  %v167_v12 = vperm.slane %v164_v8, 1 }
 0x1a4   :  { %v170_v15 = vsub.f32 %v1333_v36, %v166_v9  ;;  %v171_v16 = vsub.f32 %v1339_v38, %v167_v12 }
 0x1a6   :  { %v172_v17 = vmul.f32 1.442695, %v170_v15  ;;  %v174_v18 = vmul.f32 1.442695, %v171_v16 }
 0x1a8   :  { %1017 = vpow2.f32 %v172_v17 }
 0x1a9   :  { %1019 = vpow2.f32 %v174_v18 }
 0x1ae   :  { %v1427_v20 = vpop.eup %1017 }
 0x1af   :  { %v1429_v22 = vpop.eup %1019  ;;  %179 = vperm.xlu1 %989, %v1427_v20  }
 0x1b0   :  { %182 = vperm.xlu2 %1005, %v1429_v22  }
 0x1b7   :  { %990 = vset.pattern.permute.xlu1 %v1267_v13 }
 0x1b8   :  { %1006 = vset.pattern.permute.xlu2 %v1245_v2 }
 0x1b9   :  { %v1473_v36 = vpop.permute.xlu1 %542 }
 0x1bf   :  { %560 = vperm.xlu1 %990, %v1328_v35   ;;  %v1471_v35 = vpop.permute.xlu2 %681 }
 0x1c0   :  { %751 = vperm.xlu2 %1006, %v740_v26   ;;  %1679 = vst [vmem:[#allocation23_spill] sm:$0xff] %v1471_v35 }
 0x1c7   :  { %992 = vset.pattern.permute.xlu1 %v1245_v2  ;;  %v1477_v11 = vpop.permute.xlu2 %712 }
 0x1c8   :  { %1009 = vset.pattern.permute.xlu2 %v1258_v10  ;;  %1680 = vst [vmem:[#allocation24_spill] sm:$0xff] %v1477_v11 }
 0x1c9   :  { %v1480_v38 = vpop.permute.xlu1 %529 }
 0x1cf   :  { %599 = vperm.xlu1 %992, %v1351_v44  }
 0x1d0   :  { %757 = vperm.xlu2 %1009, %v740_v26  }
 0x1d7   :  { %994 = vset.pattern.permute.xlu1 %v1258_v10 }
 0x1d8   :  { %1011 = vset.pattern.permute.xlu2 %v1267_v13 }
 0x1df   :  { %605 = vperm.xlu1 %994, %v1351_v44  }
 0x1e7   :  { %996 = vset.pattern.permute.xlu1 %v1267_v13 }
 0x1ef   :  { %611 = vperm.xlu1 %996, %v1351_v44  }
 0x1f7   :  { %998 = vset.pattern.permute.xlu1 %v1245_v2 }
 0x1ff   :  { %675 = vperm.xlu1 %998, %v1391_v56  }
 0x207   :  { %700 = vperm.xlu1 %998, %v1372_v51  }
 0x20a   :  { %v183_v39 = vpop.permute.xlu2 %182 }
 0x20b   :  { %v185_v21 = vperm.slane %v183_v39, %v1337_v37 }
 0x20f   :  { %1002 = vset.pattern.permute.xlu1 %v1267_v13 }
 0x217   :  { %687 = vperm.xlu1 %1002, %v1391_v56  }
 0x21f   :  { %1004 = vset.pattern.permute.xlu1 %v1242_v1  ;;  %v253_v1 = vpop.permute.xlu0 %252 }
 0x221   :  { %v180_v40 = vpop.permute.xlu1 %179 }
 0x222   :  { %v184_v41 = vperm.slane %v180_v40, %v1337_v37 }
 0x224   :  { %v186_v13 = vsel %vm158_vm1, %v185_v21, %v184_v41 }
 0x225   :  { %v188_v34 = vsel %vm161_vm2, %v186_v13, 0.0 }
 0x226   :  { %189 = vadd.xlane.f32.xlu2 %v188_v34 }
 0x227   :  { %745 = vperm.xlu1 %1004, %v740_v26   ;;  %v321_v43 = vpop.permute.xlu0 %320 }
 0x22f   :  { %1008 = vset.pattern.permute.xlu1 %v1245_v2  ;;  %v1492_v44 = vpop.permute.xlu0 %523  ;;  %v1500_v2 = vpop.permute.xlu2 %751 }
 0x231   :  { %v1498_v56 = vpop.permute.xlu1 %560 }
 0x232   :  { %1681 = vst [vmem:[#allocation25_spill] sm:$0xff] %v1498_v56 }
 0x237   :  { %776 = vperm.xlu1 %1008, %v765_v32   ;;  %v1494_v45 = vpop.permute.xlu0 %624  ;;  %v1506_v9 = vpop.permute.xlu2 %757 }
 0x238   :  { %1683 = vst [vmem:[#allocation27_spill] sm:$0xff] %v1506_v9 }
 0x23e   :  { %763 = vperm.xlu2 %1011, %v740_v26  }
 0x23f   :  { %1010 = vset.pattern.permute.xlu1 %v1258_v10  ;;  %v1496_v51 = vpop.permute.xlu0 %377 }
 0x241   :  { %v1502_v8 = vpop.permute.xlu1 %599 }
 0x246   :  { %1013 = vset.pattern.permute.xlu2 %v1184_v63 }
 0x247   :  { %782 = vperm.xlu1 %1010, %v765_v32   ;;  %v1504_v10 = vpop.permute.xlu0 %706 }
 0x248   :  { %1682 = vst [vmem:[#allocation26_spill] sm:$0xff] %v1504_v10 }
 0x24f   :  { %1012 = vset.pattern.permute.xlu1 %v1184_v63  ;;  %v222_v63 = vpop.permute.xlu0 %221 }
 0x251   :  { %v1508_v12 = vpop.permute.xlu1 %605 }
 0x257   :  { %v290_v17 = vpop.permute.xlu0 %289 }
 0x25f   :  { %v1514_v34 = vpop.permute.xlu0 %466 }
 0x261   :  { %v1510_v16 = vpop.permute.xlu1 %611 }
 0x262   :  { %1684 = vst [vmem:[#allocation28_spill] sm:$0xff] %v1510_v16 }
 0x271   :  { %v1512_v39 = vpop.permute.xlu1 %675 }
 0x279   :  { %v1517_v16 = vpop.permute.xlu1 %700 }
 0x27a   :  { %1685 = vst [vmem:[#allocation29_spill] sm:$0xff] %v1517_v16 }
 0x299   :  { %v190_v15 = vpop.xlane.xlu2 %189 }
 0x29a   :  { %1021 = vrcp.f32 %v190_v15  ;;  %v202_v40 = vand.u32 2147483648, %v190_v15  ;;  %v200_v41 = vand.u32 2147483647, %v190_v15  ;;  %vm196_vm4 = vweird.f32 %v190_v15 }
 0x29c   :  { %v203_v37 = vor.u32 1.1754944e-38, %v202_v40  ;;  %vm201_vm6 = vcmp.eq.f32.partialorder %v200_v41, 8.507059e+37  ;;  %v1526_v41 = vpop.permute.xlu1 %687 }
 0x29d   :  { %1686 = vst [vmem:[#allocation30_spill] sm:$0xff] %v1526_v41 }
 0x2a0   :  { %v1022_v18 = vpop.eup %1021 }
 0x2a1   :  { %v192_v26 = vmul.f32 %v1022_v18, %v190_v15  ;;  %vm197_vm3 = vweird.f32 %v1022_v18 }
 0x2a2   :  { %vm198_vm5 = vmor %vm196_vm4, %vm197_vm3 }
 0x2a3   :  { %v193_v32 = vsub.f32 1.0, %v192_v26 }
 0x2a4   :  { %v746_v28 = vpop.permute.xlu1 %745 }
 0x2a5   :  { %v194_v21 = vmul.f32 %v1022_v18, %v193_v32  ;;  %v670_v32 = vpop.permute.xlu0 %669 }
 0x2a7   :  { %v195_v13 = vadd.f32 %v1022_v18, %v194_v21 }
 0x2a9   :  { %v199_v11 = vsel %vm198_vm5, %v1022_v18, %v195_v13 }
 0x2aa   :  { %v204_v31 = vsel %vm201_vm6, %v203_v37, %v199_v11 }
 0x2ab   :  { %v206_v10 = vperm.slane %v204_v31, 0  ;;  %v207_v26 = vperm.slane %v204_v31, 1 }
 0x2ad   :  { %v210_v56 = vmul.f32 %v1427_v20, %v206_v10  ;;  %v1522_v15 = vmul.f32 %v1429_v22, %v207_v26  ;;  %v1544_v9 = vpop.permute.xlu0 %770 }
 0x2ae   :  { %1687 = vst [vmem:[#allocation31_spill] sm:$0xff] %v1544_v9 }
 0x2af   :  { %v212_v5 = vperm.slane %v210_v56, 0  ;;  %v282_v6 = vperm.slane %v210_v56, 1  ;;  %v1519_v33 = vperm.slane %v210_v56, 2  ;;  %v1524_v21 = vperm.slane %v210_v56, 3 }
 0x2b0   :  { %v1530_v20 = vperm.slane %v210_v56, 4  ;;  %v213_v11 = vperm.slane %v1522_v15, 0  ;;  %v283_v10 = vperm.slane %v1522_v15, 1  ;;  %v1536_v13 = vperm.slane %v210_v56, 5 }
 0x2b1   :  { %v274_v40 = vmul.f32 %v222_v63, %v212_v5  ;;  %v342_v18 = vmul.f32 %v290_v17, %v282_v6  ;;  %v418_v37 = vmul.f32 %v1384_v54, %v1519_v33  ;;  %v494_v22 = vmul.f32 %v1402_v60, %v1524_v21 }
 0x2b2   :  { %v1538_v63 = vperm.slane %v210_v56, 6  ;;  %v570_v17 = vmul.f32 %v1440_v25, %v1530_v20  ;;  %v1542_v54 = vperm.slane %v210_v56, 7  ;;  %v279_v16 = vmul.f32 %v253_v1, %v213_v11 }
 0x2b3   :  { %v350_v31 = vadd.f32 %v342_v18, %v274_v40  ;;  %v646_v40 = vmul.f32 %v1451_v29, %v1536_v13  ;;  %v347_v30 = vmul.f32 %v321_v43, %v283_v10  ;;  %v359_v60 = vperm.slane %v1522_v15, 2 }
 0x2b4   :  { %v798_v35 = vmul.f32 %v746_v28, %v1542_v54  ;;  %v277_v56 = vmul.f32 %v1359_v47, %v212_v5  ;;  %v281_v9 = vmul.f32 %v1365_v49, %v213_v11  ;;  %v349_v29 = vmul.f32 %v1410_v0, %v283_v10 }
 0x2b5   :  { %v426_v26 = vadd.f32 %v418_v37, %v350_v31  ;;  %v722_v31 = vmul.f32 %v670_v32, %v1538_v63  ;;  %v1556_v1 = vperm.slane %v1522_v15, 3  ;;  %v1560_v32 = vperm.slane %v1522_v15, 4 }
 0x2b6   :  { %v275_v28 = vmul.f32 %v1347_v42, %v212_v5  ;;  %v343_v47 = vmul.f32 %v1369_v50, %v282_v6  ;;  %v280_v49 = vmul.f32 %v1362_v48, %v213_v11  ;;  %v348_v0 = vmul.f32 %v1380_v53, %v283_v10 }
 0x2b7   :  { %v502_v41 = vadd.f32 %v494_v22, %v426_v26  ;;  %v345_v22 = vmul.f32 %v1376_v52, %v282_v6  ;;  %v355_v26 = vadd.f32 %v347_v30, %v279_v16  ;;  %v1566_v16 = vadd.f32 %v349_v29, %v281_v9 }
 0x2b8   :  { %v421_v42 = vmul.f32 %v1388_v55, %v1519_v33  ;;  %v497_v50 = vmul.f32 %v1433_v23, %v1524_v21  ;;  %v276_v48 = vmul.f32 %v1356_v46, %v212_v5  ;;  %v575_v53 = vmul.f32 %v1444_v27, %v1560_v32 }
 0x2b9   :  { %v578_v18 = vadd.f32 %v570_v17, %v502_v41  ;;  %v423_v41 = vmul.f32 %v1396_v58, %v359_v60  ;;  %v409_v17 = vpop.permute.xlu0 %408  ;;  %v353_v52 = vadd.f32 %v345_v22, %v277_v56  ;;  %v419_v58 = vmul.f32 %v1415_v4, %v1519_v33 }
 0x2ba   :  { %v344_v4 = vmul.f32 %v1398_v59, %v282_v6  ;;  %v1583_v55 = vperm.slane %v1522_v15, 5  ;;  %v356_v23 = vadd.f32 %v348_v0, %v280_v49  ;;  %v420_v27 = vmul.f32 %v1496_v51, %v1519_v33 }
 0x2bb   :  { %v654_v37 = vadd.f32 %v646_v40, %v578_v18  ;;  %v431_v30 = vadd.f32 %v423_v41, %v355_v26  ;;  %v351_v40 = vadd.f32 %v343_v47, %v275_v28  ;;  %v499_v18 = vmul.f32 %v1413_v3, %v1556_v1 }
 0x2bc   :  { %v571_v3 = vmul.f32 %v1492_v44, %v1530_v20  ;;  %v352_v46 = vadd.f32 %v344_v4, %v276_v48  ;;  %v1590_v5 = vperm.slane %v1522_v15, 6  ;;  %v278_v59 = vmul.f32 %v1393_v57, %v213_v11 }
 0x2bd   :  { %v730_v25 = vadd.f32 %v722_v31, %v654_v37  ;;  %v427_v9 = vadd.f32 %v419_v58, %v351_v40  ;;  %v495_v37 = vmul.f32 %v1425_v19, %v1524_v21  ;;  %v429_v31 = vadd.f32 %v421_v42, %v353_v52  ;;  %v777_v52 = vpop.permute.xlu1 %776  ;;  %v1689_v58 = vld [vmem:[#allocation18_spill] sm:$0xff] }
 0x2be   :  { %v424_v19 = vmul.f32 %v1421_v14, %v359_v60  ;;  %v346_v6 = vmul.f32 %v1404_v61, %v283_v10  ;;  %v647_v26 = vmul.f32 %v1502_v8, %v1536_v13  ;;  %v428_v29 = vadd.f32 %v420_v27, %v352_v46 }
 0x2bf   :  { %v806_v43 = vadd.f32 %v798_v35, %v730_v25  ;;  %v425_v35 = vmul.f32 %v409_v17, %v359_v60  ;;  %v507_v25 = vadd.f32 %v499_v18, %v431_v30  ;;  %v503_v56 = vadd.f32 %v495_v37, %v427_v9  ;;  %v1692_v37 = vld [vmem:[#allocation27_spill] sm:$0xff] }
 0x2c0   :  { %v496_v44 = vmul.f32 %v1407_v62, %v1524_v21  ;;  %v432_v41 = vadd.f32 %v424_v19, %v356_v23  ;;  %v354_v33 = vadd.f32 %v346_v6, %v278_v59  ;;  %v422_v51 = vmul.f32 %v1419_v7, %v359_v60  ;;  %v1693_v23 = vld [vmem:[#allocation22_spill] sm:$0xff]  ;;  %v1695_v59 = vld [vmem:[#allocation20_spill] sm:$0xff] }
 0x2c1   :  { %831 = vperm.xlu1 %1012, %v806_v43   ;;  %v579_v22 = vadd.f32 %v571_v3, %v503_v56  ;;  %v583_v43 = vadd.f32 %v575_v53, %v507_v25  ;;  %v723_v14 = vmul.f32 %v1512_v39, %v1538_v63  ;;  %v572_v61 = vmul.f32 %v1480_v38, %v1530_v20  ;;  %v536_v40 = vpop.permute.xlu0 %535 }
 0x2c2   :  { %v504_v57 = vadd.f32 %v496_v44, %v428_v29  ;;  %v651_v8 = vmul.f32 %v1494_v45, %v1583_v55  ;;  %v500_v11 = vmul.f32 %v1437_v24, %v1556_v1  ;;  %v430_v62 = vadd.f32 %v422_v51, %v354_v33  ;;  %v1697_v44 = vld [vmem:[#allocation28_spill] sm:$0xff] }
 0x2c3   :  { %v655_v28 = vadd.f32 %v647_v26, %v579_v22  ;;  %v498_v21 = vmul.f32 %v1514_v34, %v1556_v1  ;;  %v799_v7 = vmul.f32 %v1500_v2, %v1542_v54  ;;  %v648_v39 = vmul.f32 %v1508_v12, %v1536_v13  ;;  %v1688_v34 = vld [vmem:[#allocation23_spill] sm:$0xff] }
 0x2c4   :  { %v580_v60 = vadd.f32 %v572_v61, %v504_v57  ;;  %v505_v47 = vadd.f32 %v497_v50, %v429_v31  ;;  %v508_v38 = vadd.f32 %v500_v11, %v432_v41  ;;  %v574_v45 = vmul.f32 %v1473_v36, %v1560_v32  ;;  %v1690_v50 = vld [vmem:[#allocation19_spill] sm:$0xff]  ;;  %v1691_v36 = vld [vmem:[#allocation29_spill] sm:$0xff] }
 0x2c5   :  { %v731_v10 = vadd.f32 %v723_v14, %v655_v28  ;;  %v506_v17 = vadd.f32 %v498_v21, %v430_v62  ;;  %v659_v24 = vadd.f32 %v651_v8, %v583_v43  ;;  %v724_v0 = vmul.f32 %v1688_v34, %v1538_v63  ;;  %v1696_v26 = vld [vmem:[#allocation31_spill] sm:$0xff]  ;;  %v1698_v14 = vld [vmem:[#allocation25_spill] sm:$0xff]  ;;  %v1700_v8 = vld [vmem:[#allocation30_spill] sm:$0xff]  ;;  %v783_v62 = vpop.permute.xlu1 %782  ;;  %v764_v21 = vpop.permute.xlu2 %763 }
 0x2c6   :  { %v656_v49 = vadd.f32 %v648_v39, %v580_v60  ;;  %v739_v2 = vperm.slane %v1522_v15, 7  ;;  %v576_v42 = vmul.f32 %v1689_v58, %v1560_v32  ;;  %v650_v18 = vmul.f32 %v1690_v50, %v1583_v55  ;;  %v1701_v60 = vld [vmem:[#allocation21_spill] sm:$0xff]  ;;  %v818_v58 = vld [vmem:[#allocation10] sm:$0xff] }
 0x2c7   :  { %v807_v30 = vadd.f32 %v799_v7, %v731_v10  ;;  %v582_v12 = vadd.f32 %v574_v45, %v506_v17  ;;  %v573_v48 = vmul.f32 %v536_v40, %v1530_v20  ;;  %v727_v53 = vmul.f32 %v1691_v36, %v1590_v5  ;;  %v1694_v20 = vld [vmem:[#allocation17_spill] sm:$0xff] }
 0x2c8   :  { %v732_v9 = vadd.f32 %v724_v0, %v656_v49  ;;  %v800_v4 = vmul.f32 %v1692_v37, %v1542_v54  ;;  %v433_v31 = vadd.f32 %v425_v35, %v1566_v16  ;;  %v584_v15 = vadd.f32 %v576_v42, %v508_v38  ;;  %v821_v0 = vld [vmem:[#allocation10 + $0x18] sm:$0xff]  ;;  %v820_v40 = vld [vmem:[#allocation10 + $0x10] sm:$0xff] }
 0x2c9   :  { %834 = vperm.xlu2 %1013, %v807_v30   ;;  %v658_v25 = vadd.f32 %v650_v18, %v582_v12  ;;  %v726_v56 = vmul.f32 %v1693_v23, %v1590_v5  ;;  %v581_v3 = vadd.f32 %v573_v48, %v505_v47  ;;  %v735_v46 = vadd.f32 %v727_v53, %v659_v24 }
 0x2ca   :  { %v808_v27 = vadd.f32 %v800_v4, %v732_v9  ;;  %v501_v19 = vmul.f32 %v1694_v20, %v1556_v1  ;;  %v652_v6 = vmul.f32 %v1695_v59, %v1583_v55  ;;  %v802_v29 = vmul.f32 %v1696_v26, %v739_v2  ;;  %v1699_v1 = vld [vmem:[#allocation26_spill] sm:$0xff]  ;;  %889 = vmatpush.msra.mxu1 %v821_v0 }
 0x2cb   :  { %v734_v22 = vadd.f32 %v726_v56, %v658_v25  ;;  %v649_v16 = vmul.f32 %v1697_v44, %v1536_v13  ;;  %v803_v35 = vmul.f32 %v777_v52, %v739_v2  ;;  %v577_v57 = vmul.f32 %v1698_v14, %v1560_v32  ;;  %v1702_v52 = vld [vmem:[#allocation24_spill] sm:$0xff]  ;;  %v916_v44 = vpop.f32.mrf.mxu2 }
 0x2cc   :  { %837 = vperm.xlu0 %1014, %v808_v27   ;;  %v509_v43 = vadd.f32 %v501_v19, %v433_v31  ;;  %v660_v41 = vadd.f32 %v652_v6, %v584_v15  ;;  %v728_v61 = vmul.f32 %v1699_v1, %v1590_v5  ;;  %v725_v11 = vmul.f32 %v1700_v8, %v1538_v63  ;;  %v789_v63 = vpop.permute.xlu0 %788 }
 0x2cd   :  { %v810_v33 = vadd.f32 %v802_v29, %v734_v22  ;;  %v657_v51 = vadd.f32 %v649_v16, %v581_v3  ;;  %v811_v28 = vadd.f32 %v803_v35, %v735_v46  ;;  %v653_v39 = vmul.f32 %v1701_v60, %v1583_v55  ;;  %890 = vmatpush.msra.mxu1 %v820_v40  ;;  %v819_v55 = vld [vmem:[#allocation10 + $0x8] sm:$0xff] }
 0x2ce   :  { %v585_v13 = vadd.f32 %v577_v57, %v509_v43  ;;  %v736_v10 = vadd.f32 %v728_v61, %v660_v41  ;;  %v804_v47 = vmul.f32 %v783_v62, %v739_v2  ;;  %v801_v38 = vmul.f32 %v764_v21, %v1542_v54  ;;  %v1016_v29 = vld [vmem:[%s1668_s6] ss:$0 sm:$0xff] }
 0x2cf   :  { %843 = vperm.xlu1 %1012, %v810_v33   ;;  %v733_v7 = vadd.f32 %v725_v11, %v657_v51  ;;  %v729_v24 = vmul.f32 %v1702_v52, %v1590_v5  ;;  %v805_v49 = vmul.f32 %v789_v63, %v739_v2  ;;  %891 = vmatpush.msra.mxu1 %v819_v55  ;;  %v1703_v5 = vld [vmem:[#allocation16_spill] sm:$0xff] }
 0x2d0   :  { %v661_v32 = vadd.f32 %v653_v39, %v585_v13  ;;  %v812_v17 = vadd.f32 %v804_v47, %v736_v10  ;;  %v855_v18 = vadd.s32 4294967288, %v1703_v5  ;;  %v859_v48 = vadd.s32 4294967280, %v1703_v5 }
 0x2d1   :  { %846 = vperm.xlu2 %1013, %v811_v28   ;;  %v809_v45 = vadd.f32 %v801_v38, %v733_v7  ;;  %892 = vmatpush.msra.mxu1 %v818_v58  ;;  %v863_v4 = vadd.s32 4294967272, %v1703_v5 }
 0x2d2   :  { %v737_v30 = vadd.f32 %v729_v24, %v661_v32 }
 0x2d4   :  { %v813_v34 = vadd.f32 %v805_v49, %v737_v30 }
 0x2d7   :  { %849 = vperm.xlu1 %1012, %v812_v17  }
 0x2d9   :  { %840 = vperm.xlu2 %1013, %v809_v45  }
 0x2df   :  { %852 = vperm.xlu1 %1012, %v813_v34  }
 0x323   :  { %v835_v42 = vpop.permute.xlu2 %834 }
 0x324   :  { %v856_v9 = vperm.slane %v835_v42, %v855_v18 }
 0x32b   :  { %v847_v50 = vpop.permute.xlu2 %846 }
 0x32c   :  { %v868_v56 = vperm.slane %v847_v50, %v855_v18 }
 0x333   :  { %v832_v54 = vpop.permute.xlu1 %831  ;;  %v841_v25 = vpop.permute.xlu2 %840 }
 0x334   :  { %v854_v2 = vperm.slane %v832_v54, %v1703_v5  ;;  %v864_v27 = vperm.slane %v841_v25, %v863_v4 }
 0x336   :  { %v858_v31 = vsel %vm857_vm7, %v856_v9, %v854_v2 }
 0x33e   :  { %v838_v53 = vpop.permute.xlu0 %837 }
 0x33f   :  { %v860_v37 = vperm.slane %v838_v53, %v859_v48 }
 0x341   :  { %v844_v12 = vpop.permute.xlu1 %843  ;;  %v862_v3 = vsel %vm861_vm8, %v860_v37, %v858_v31 }
 0x342   :  { %v867_v15 = vperm.slane %v844_v12, %v1703_v5  ;;  %v866_v6 = vsel %vm865_vm9, %v864_v27, %v862_v3 }
 0x344   :  { %v869_v20 = vsel %vm857_vm7, %v868_v56, %v867_v15 }
 0x349   :  { %v850_v36 = vpop.permute.xlu1 %849 }
 0x34a   :  { %v870_v23 = vperm.slane %v850_v36, %v859_v48 }
 0x34c   :  { %v871_v59 = vsel %vm861_vm8, %v870_v23, %v869_v20 }
 0x351   :  { %v853_v46 = vpop.permute.xlu1 %852 }
 0x352   :  { %v872_v19 = vperm.slane %v853_v46, %v863_v4 }
 0x354   :  { %v873_v22 = vsel %vm865_vm9, %v872_v19, %v871_v59 }
 0x355   :  { %v874_v26 = vsel %vm158_vm1, %v873_v22, %v866_v6 }
 0x356   :  { %947 = vmatmul.msk.f32.vlgmr.msra.gmra.mxu1 %vm114_vm0, %v874_v26 }
 0x3d3   :  { %v894_v16 = vpop.f32.mrf.mxu1 }
 0x3d4   :  { %v917_v35 = vadd.f32 %v916_v44, %v894_v16 }
 0x3d6   :  { %v923_v43 = vadd.f32 %v1016_v29, %v917_v35 }
 0x3d8   :  { %1023 = vtanh.f32 %v923_v43 }
 0x3de   :  { %v1024_v41 = vpop.eup %1023 }
 0x3df   :  { %926 = vst.msk [vmem:[#allocation11] sm:$0x3] %vm925_vm10, %v1024_v41 }
 0x3e0   :  { %937 = dma.vmem_to_hbm [thread:$0]  %s933_s27, 32, %s935_s30, [#allocation4]  }
 0x3e1   :  { %1175 = dma.done.wait [#allocation4], 32  }
 0x3e2   :  { %1176 = vsyncadd [#allocation4], 4294967264 }
 0x3e3   :  { %942 = vsyncpa [#allocation3], 1 }
 0x3e4   :  { %943 = vsyncpa [#allocation6], 1 }
 0x3e5   :  { %944 = vsyncpa [#allocation9], 1 }
 0x3e6   :  { %945 = vsyncpa [#allocation4], 1 }

</bundles_post_ra>
